<compile_context>
chip_gen: v6e
topology: v6e:2x2x1
jax: 0.10.0
libtpu: 0.0.40
codegen_flags: <defaults>
</compile_context>

<pallas_src>
import numpy as np
import jax
import jax.numpy as jnp
from jax import lax
from jax.experimental import pallas as pl
from jax.experimental.pallas import tpu as pltpu


# --------------------------------- helpers ----------------------------------
def _round_up(x, m):
    return (x + m - 1) // m * m


def _pad_to(x, shape):
    pads = [(0, t - s) for s, t in zip(x.shape, shape)]
    if any(p[1] for p in pads):
        return jnp.pad(x, pads)
    return x


def _choose_tiles(B, S, H):
    # Batch tile: large enough to feed the MXU once S is tiled; B is padded
    # to a multiple of TB in the wrapper (no whole-batch fallback).
    TB = 64 if B >= 64 else 8
    # Sequence tile: whole (8-padded) sequence when short; otherwise a
    # multiple of 128 sized so the double-buffered bf16 hid block stays
    # within ~16 MiB (v7x 64 MiB budget incl. weights/outputs/scratch).
    Sp = _round_up(max(S, 8), 8)
    if Sp > 512:
        budget = 16 * 1024 * 1024
        ts = budget // (2 * TB * H * 2)              # bf16, double-buffered
        TS = max(128, min(512, (ts // 128) * 128))
        Sp = _round_up(S, TS)
    else:
        TS = Sp
    return TB, TS, Sp


def _vmem_estimate(TB, TS, H, Cp, emit_features):
    bf, f4 = 2, 4
    ins = (TB * TS * H * bf + TB * 2 * TS * bf + TB * H * bf + TB * 2 * f4
           + 3 * (H * H * bf + H * f4) + 3 * H * Cp * bf + Cp * f4)
    outs = TB * Cp * f4 + (3 * TB * H * f4 if emit_features else 0)
    scratch = TB * 2 * H * f4
    return 2 * (ins + outs) + scratch                # 2x: double buffering


# ----------------------------- fused head kernel ----------------------------
def _make_head_kernel(emit_features):
    def kernel(hid_ref, em_ref, pool_ref, inv_ref,
               wc_ref, bc_ref, w1_ref, b1_ref, w2_ref, b2_ref,
               woc_ref, wo1_ref, wo2_ref, bo_ref, *rest):
        out_ref = rest[0]
        acc_ref = rest[-1]                                    # (TB, 2, H) f32
        s = pl.program_id(1)
        ns = pl.num_programs(1)

        @pl.when(s == 0)
        def _():
            acc_ref[...] = jnp.zeros_like(acc_ref)

        # masked entity sums on the MXU, bf16 operands, f32 accumulation:
        # (TB, 2, TS) @ (TB, TS, H) -> (TB, 2, H)
        acc_ref[...] += lax.dot_general(
            em_ref[...], hid_ref[...],
            dimension_numbers=(((2,), (1,)), ((0,), (0,))),
            preferred_element_type=jnp.float32)

        @pl.when(s == ns - 1)
        def _():
            inv = inv_ref[...]                                # (TB, 2) f32
            sums = acc_ref[...]                               # (TB, 2, H) f32
            avg1 = sums[:, 0, :] * inv[:, 0:1]
            avg2 = sums[:, 1, :] * inv[:, 1:2]

            def fc(x, w_ref, b_ref):                          # Linear + tanh
                y = jnp.dot(x.astype(jnp.bfloat16), w_ref[...],
                            preferred_element_type=jnp.float32)
                return jnp.tanh(y + b_ref[...])

            cls_emb = fc(pool_ref[...], wc_ref, bc_ref)       # (TB, H) f32
            ent1 = fc(avg1, w1_ref, b1_ref)
            ent2 = fc(avg2, w2_ref, b2_ref)

            if emit_features:
                cls_out, e1_out, e2_out = rest[1], rest[2], rest[3]
                cls_out[...] = cls_emb
                e1_out[...] = ent1
                e2_out[...] = ent2

            # output = concat([cls,e1,e2]) @ W_out + b_out, expressed as three
            # H-wide matmuls against the pre-split (and lane-padded) W_out.
            out = (jnp.dot(cls_emb.astype(jnp.bfloat16), woc_ref[...],
                           preferred_element_type=jnp.float32)
                   + jnp.dot(ent1.astype(jnp.bfloat16), wo1_ref[...],
                             preferred_element_type=jnp.float32)
                   + jnp.dot(ent2.astype(jnp.bfloat16), wo2_ref[...],
                             preferred_element_type=jnp.float32)
                   + bo_ref[...])
            out_ref[...] = out

    return kernel


# --------------------------------- wrapper ----------------------------------
def bert_relation_classifier_forward(bert_out, pooler_out, e1_mask, e2_mask,
                                     params, return_features=False):
    """Post-BERT head of BertRelationClassifier.forward.

    bert_out:   (B, S, H)  == outputs.last_hidden_state
    pooler_out: (B, H)     == outputs.pooler_output
    e1_mask / e2_mask: (B, S) {0,1}
    """
    B, S, H = bert_out.shape
    C = params["W_out"].shape[1]
    bf16, f32 = jnp.bfloat16, jnp.float32

    TB, TS, Sp = _choose_tiles(B, S, H)
    Bp = _round_up(B, TB)
    Cp = _round_up(C, 128)

    # bf16 streaming of the big activation tensors (f32 accumulation in-kernel)
    hid = _pad_to(bert_out.astype(bf16), (Bp, Sp, H))
    pool = _pad_to(pooler_out.astype(bf16), (Bp, H))

    em_i = jnp.stack([e1_mask, e2_mask], axis=1)              # (B, 2, S)
    cnt = jnp.sum((em_i != 0).astype(f32), axis=2)            # (B, 2)
    inv_len = 1.0 / jnp.maximum(cnt, 1.0)                     # clamp empty spans
    em = _pad_to(em_i.astype(bf16), (Bp, 2, Sp))
    inv_len = _pad_to(inv_len, (Bp, 2))

    W_out = params["W_out"]
    woc = _pad_to(W_out[0:H].astype(bf16), (H, Cp))
    wo1 = _pad_to(W_out[H:2 * H].astype(bf16), (H, Cp))
    wo2 = _pad_to(W_out[2 * H:3 * H].astype(bf16), (H, Cp))
    bo = _pad_to(params["b_out"].reshape(1, C).astype(f32), (1, Cp))

    wc = params["W_cls"].astype(bf16)
    w1 = params["W_e1"].astype(bf16)
    w2 = params["W_e2"].astype(bf16)
    bc = params["b_cls"].reshape(1, H).astype(f32)
    b1 = params["b_e1"].reshape(1, H).astype(f32)
    b2 = params["b_e2"].reshape(1, H).astype(f32)

    grid = (Bp // TB, Sp // TS)        # batch parallel, sequence reduction last

    def wmap(b, s):                    # weights stay VMEM-resident
        return (0, 0)

    in_specs = [
        pl.BlockSpec((TB, TS, H), lambda b, s: (b, s, 0)),    # hidden states
        pl.BlockSpec((TB, 2, TS), lambda b, s: (b, 0, s)),    # stacked masks
        pl.BlockSpec((TB, H), lambda b, s: (b, 0)),           # pooler
        pl.BlockSpec((TB, 2), lambda b, s: (b, 0)),           # 1/len
        pl.BlockSpec((H, H), wmap), pl.BlockSpec((1, H), wmap),   # fc_cls
        pl.BlockSpec((H, H), wmap), pl.BlockSpec((1, H), wmap),   # fc_e1
        pl.BlockSpec((H, H), wmap), pl.BlockSpec((1, H), wmap),   # fc_e2
        pl.BlockSpec((H, Cp), wmap), pl.BlockSpec((H, Cp), wmap),
        pl.BlockSpec((H, Cp), wmap),                              # W_out splits
        pl.BlockSpec((1, Cp), wmap),                              # b_out
    ]

    out_spec_logits = pl.BlockSpec((TB, Cp), lambda b, s: (b, 0))
    out_spec_feat = pl.BlockSpec((TB, H), lambda b, s: (b, 0))

    if return_features:
        out_shape = (jax.ShapeDtypeStruct((Bp, Cp), f32),
                     jax.ShapeDtypeStruct((Bp, H), f32),
                     jax.ShapeDtypeStruct((Bp, H), f32),
                     jax.ShapeDtypeStruct((Bp, H), f32))
        out_specs = (out_spec_logits, out_spec_feat, out_spec_feat, out_spec_feat)
    else:
        out_shape = jax.ShapeDtypeStruct((Bp, Cp), f32)
        out_specs = out_spec_logits

    est = _vmem_estimate(TB, TS, H, Cp, return_features)
    vmem_limit = int(min(56 * 2**20, max(32 * 2**20, 2 * est)))   # v7x-safe

    result = pl.pallas_call(
        _make_head_kernel(return_features),
        out_shape=out_shape,
        grid=grid,
        in_specs=in_specs,
        out_specs=out_specs,
        scratch_shapes=[pltpu.VMEM((TB, 2, H), jnp.float32)],
        compiler_params=pltpu.CompilerParams(
            dimension_semantics=("parallel", "arbitrary"),
            vmem_limit_bytes=vmem_limit),
    )(hid, em, pool, inv_len, wc, bc, w1, b1, w2, b2, woc, wo1, wo2, bo)

    if return_features:
        out, cls_emb, ent1, ent2 = result
        h = jnp.concatenate([cls_emb[:B], ent1[:B], ent2[:B]], axis=-1)
        return out[:B, :C], h
    return result[:B, :C]


# ----------------------------- numpy reference -------------------------------
def reference_forward(bert_out, pooler, e1_mask, e2_mask, p):
    bert_out = np.asarray(bert_out, np.float32)
    pooler = np.asarray(pooler, np.float32)

    def ent_avg(m):
        m = np.asarray(m, np.float32)
        s = np.einsum("bs,bsh->bh", m, bert_out)
        l = (m != 0).sum(axis=1, keepdims=True).astype(np.float32)
        return s / l

    def fc(x, w, b, act=True):
        y = x @ np.asarray(w, np.float32) + np.asarray(b, np.float32)
        return np.tanh(y) if act else y

    cls_emb = fc(pooler, p["W_cls"], p["b_cls"])
    ent1 = fc(ent_avg(e1_mask), p["W_e1"], p["b_e1"])
    ent2 = fc(ent_avg(e2_mask), p["W_e2"], p["b_e2"])
    h = np.concatenate([cls_emb, ent1, ent2], axis=-1)
    out = fc(h, p["W_out"], p["b_out"], act=False)
    return out, h


# ----------------------------------- main ------------------------------------
if __name__ == "__main__":
    B, S, H, C = 2, 8, 32, 5   # batch, seq, hidden, n_class (small demo shapes)

    key = jax.random.PRNGKey(0)
    ks = jax.random.split(key, 12)

    # simulated BERT outputs (encoder itself is out of scope, see TODO above)
    bert_out = jax.random.normal(ks[0], (B, S, H), dtype=jnp.float32)
    pooler_out = jax.random.normal(ks[1], (B, H), dtype=jnp.float32)

    # entity span masks (different spans per example)
    e1_mask = jnp.zeros((B, S), jnp.int32)
    e1_mask = e1_mask.at[0, 1:3].set(1).at[1, 0:4].set(1)
    e2_mask = jnp.zeros((B, S), jnp.int32)
    e2_mask = e2_mask.at[0, 4:7].set(1).at[1, 5:8].set(1)

    params = {
        "W_cls": 0.1 * jax.random.normal(ks[2], (H, H), dtype=jnp.float32),
        "b_cls": 0.1 * jax.random.normal(ks[3], (H,), dtype=jnp.float32),
        "W_e1": 0.1 * jax.random.normal(ks[4], (H, H), dtype=jnp.float32),
        "b_e1": 0.1 * jax.random.normal(ks[5], (H,), dtype=jnp.float32),
        "W_e2": 0.1 * jax.random.normal(ks[6], (H, H), dtype=jnp.float32),
        "b_e2": 0.1 * jax.random.normal(ks[7], (H,), dtype=jnp.float32),
        "W_out": 0.1 * jax.random.normal(ks[8], (3 * H, C), dtype=jnp.float32),
        "b_out": 0.1 * jax.random.normal(ks[9], (C,), dtype=jnp.float32),
    }

    out, h = bert_relation_classifier_forward(
        bert_out, pooler_out, e1_mask, e2_mask, params, return_features=True)
    out_nf = bert_relation_classifier_forward(
        bert_out, pooler_out, e1_mask, e2_mask, params, return_features=False)
    jax.block_until_ready((out, h, out_nf))

    out_ref, h_ref = reference_forward(
        np.asarray(bert_out), np.asarray(pooler_out),
        np.asarray(e1_mask), np.asarray(e2_mask),
        {k: np.asarray(v) for k, v in params.items()})

    assert np.allclose(np.asarray(h), h_ref, rtol=2e-2, atol=2e-2), \
        np.abs(np.asarray(h) - h_ref).max()
    assert np.allclose(np.asarray(out), out_ref, rtol=2e-2, atol=2e-2), \
        np.abs(np.asarray(out) - out_ref).max()
    assert np.allclose(np.asarray(out_nf), out_ref, rtol=2e-2, atol=2e-2), \
        np.abs(np.asarray(out_nf) - out_ref).max()

    print("KERNEL_OK")
</pallas_src>

<mosaic_0001>
module attributes {stable_mosaic.version = 11 : i64} {
  func.func @kernel(%arg0: i32, %arg1: i32, %arg2: memref<8x8x32xbf16, #tpu.memory_space<vmem>>, %arg3: memref<8x2x8xbf16, #tpu.memory_space<vmem>>, %arg4: memref<8x32xbf16, #tpu.memory_space<vmem>>, %arg5: memref<8x2xf32, #tpu.memory_space<vmem>>, %arg6: memref<32x32xbf16, #tpu.memory_space<vmem>>, %arg7: memref<1x32xf32, #tpu.memory_space<vmem>>, %arg8: memref<32x32xbf16, #tpu.memory_space<vmem>>, %arg9: memref<1x32xf32, #tpu.memory_space<vmem>>, %arg10: memref<32x32xbf16, #tpu.memory_space<vmem>>, %arg11: memref<1x32xf32, #tpu.memory_space<vmem>>, %arg12: memref<32x128xbf16, #tpu.memory_space<vmem>>, %arg13: memref<32x128xbf16, #tpu.memory_space<vmem>>, %arg14: memref<32x128xbf16, #tpu.memory_space<vmem>>, %arg15: memref<1x128xf32, #tpu.memory_space<vmem>>, %arg16: memref<8x128xf32, #tpu.memory_space<vmem>>, %arg17: memref<8x32xf32, #tpu.memory_space<vmem>>, %arg18: memref<8x32xf32, #tpu.memory_space<vmem>>, %arg19: memref<8x32xf32, #tpu.memory_space<vmem>>, %arg20: memref<8x2x32xf32, #tpu.memory_space<vmem>>) attributes {dimension_semantics = [#tpu.dimension_semantics<parallel>, #tpu.dimension_semantics<arbitrary>], iteration_bounds = array<i64: 1, 1>, scalar_prefetch = 0 : i64, scratch_operands = 1 : i64, tpu.core_type = #tpu.core_type<tc>, window_params = [{transform_indices = @transform_0, window_bounds = array<i64: 8, 8, 32>}, {transform_indices = @transform_1, window_bounds = array<i64: 8, 2, 8>}, {transform_indices = @transform_2, window_bounds = array<i64: 8, 32>}, {transform_indices = @transform_3, window_bounds = array<i64: 8, 2>}, {pipeline_mode = #tpu.pipeline_mode<synchronous>, transform_indices = @transform_4, window_bounds = array<i64: 32, 32>}, {pipeline_mode = #tpu.pipeline_mode<synchronous>, transform_indices = @transform_5, window_bounds = array<i64: 1, 32>}, {pipeline_mode = #tpu.pipeline_mode<synchronous>, transform_indices = @transform_6, window_bounds = array<i64: 32, 32>}, {pipeline_mode = #tpu.pipeline_mode<synchronous>, transform_indices = @transform_7, window_bounds = array<i64: 1, 32>}, {pipeline_mode = #tpu.pipeline_mode<synchronous>, transform_indices = @transform_8, window_bounds = array<i64: 32, 32>}, {pipeline_mode = #tpu.pipeline_mode<synchronous>, transform_indices = @transform_9, window_bounds = array<i64: 1, 32>}, {pipeline_mode = #tpu.pipeline_mode<synchronous>, transform_indices = @transform_10, window_bounds = array<i64: 32, 128>}, {pipeline_mode = #tpu.pipeline_mode<synchronous>, transform_indices = @transform_11, window_bounds = array<i64: 32, 128>}, {pipeline_mode = #tpu.pipeline_mode<synchronous>, transform_indices = @transform_12, window_bounds = array<i64: 32, 128>}, {pipeline_mode = #tpu.pipeline_mode<synchronous>, transform_indices = @transform_13, window_bounds = array<i64: 1, 128>}, {transform_indices = @transform_14, window_bounds = array<i64: 8, 128>}, {transform_indices = @transform_15, window_bounds = array<i64: 8, 32>}, {transform_indices = @transform_16, window_bounds = array<i64: 8, 32>}, {transform_indices = @transform_17, window_bounds = array<i64: 8, 32>}]} {
    %c0_i32 = arith.constant 0 : i32
    %0 = arith.cmpi eq, %arg1, %c0_i32 : i32
    %1 = arith.extui %0 : i1 to i32
    %c0_i32_0 = arith.constant 0 : i32
    %2 = arith.cmpi ne, %1, %c0_i32_0 : i32
    scf.if %2 {
      %cst_14 = arith.constant 0.000000e+00 : f32
      %12 = vector.broadcast %cst_14 : f32 to vector<8x2x32xf32>
      %c0_15 = arith.constant 0 : index
      %c0_16 = arith.constant 0 : index
      %c0_17 = arith.constant 0 : index
      %13 = vector.load %arg20[%c0_15, %c0_16, %c0_17] : memref<8x2x32xf32, #tpu.memory_space<vmem>>, vector<8x2x32xf32>
      tpu.vector_store %arg20[%c0_15, %c0_16, %c0_17], %12 {strides = array<i32>} : memref<8x2x32xf32, #tpu.memory_space<vmem>>, vector<8x2x32xf32>,
    } else {
    }
    %c0 = arith.constant 0 : index
    %c0_1 = arith.constant 0 : index
    %c0_2 = arith.constant 0 : index
    %3 = vector.load %arg20[%c0, %c0_1, %c0_2] : memref<8x2x32xf32, #tpu.memory_space<vmem>>, vector<8x2x32xf32>
    %c0_3 = arith.constant 0 : index
    %c0_4 = arith.constant 0 : index
    %c0_5 = arith.constant 0 : index
    %4 = vector.load %arg3[%c0_3, %c0_4, %c0_5] : memref<8x2x8xbf16, #tpu.memory_space<vmem>>, vector<8x2x8xbf16>
    %c0_6 = arith.constant 0 : index
    %c0_7 = arith.constant 0 : index
    %c0_8 = arith.constant 0 : index
    %5 = vector.load %arg2[%c0_6, %c0_7, %c0_8] : memref<8x8x32xbf16, #tpu.memory_space<vmem>>, vector<8x8x32xbf16>
    %cst = arith.constant dense<0.000000e+00> : vector<8x2x32xf32>
    %6 = tpu.matmul %4, %5, %cst {dimension_numbers = #tpu.dot_dimension_numbers<[2], [1], [1], [2], [0, 0, 0, 1, 1, 2], [0], [0]>} : vector<8x2x8xbf16>, vector<8x8x32xbf16>, vector<8x2x32xf32> -> vector<8x2x32xf32>
    %7 = arith.addf %3, %6 : vector<8x2x32xf32>
    %c0_9 = arith.constant 0 : index
    %c0_10 = arith.constant 0 : index
    %c0_11 = arith.constant 0 : index
    %8 = vector.load %arg20[%c0_9, %c0_10, %c0_11] : memref<8x2x32xf32, #tpu.memory_space<vmem>>, vector<8x2x32xf32>
    tpu.vector_store %arg20[%c0_9, %c0_10, %c0_11], %7 {strides = array<i32>} : memref<8x2x32xf32, #tpu.memory_space<vmem>>, vector<8x2x32xf32>,
    %c0_i32_12 = arith.constant 0 : i32
    %9 = arith.cmpi eq, %arg1, %c0_i32_12 : i32
    %10 = arith.extui %9 : i1 to i32
    %c0_i32_13 = arith.constant 0 : i32
    %11 = arith.cmpi ne, %10, %c0_i32_13 : i32
    scf.if %11 {
      %c0_14 = arith.constant 0 : index
      %c0_15 = arith.constant 0 : index
      %12 = vector.load %arg5[%c0_14, %c0_15] : memref<8x2xf32, #tpu.memory_space<vmem>>, vector<8x2xf32>
      %c0_16 = arith.constant 0 : index
      %c0_17 = arith.constant 0 : index
      %c0_18 = arith.constant 0 : index
      %13 = vector.load %arg20[%c0_16, %c0_17, %c0_18] : memref<8x2x32xf32, #tpu.memory_space<vmem>>, vector<8x2x32xf32>
      %14 = vector.extract_strided_slice %13 {offsets = [0, 0, 0], sizes = [8, 1, 32], strides = [1, 1, 1]} : vector<8x2x32xf32> to vector<8x1x32xf32>
      %15 = vector.shape_cast %14 : vector<8x1x32xf32> to vector<8x32xf32>
      %16 = vector.extract_strided_slice %12 {offsets = [0, 0], sizes = [8, 1], strides = [1, 1]} : vector<8x2xf32> to vector<8x1xf32>
      %17 = vector.broadcast %16 : vector<8x1xf32> to vector<8x32xf32>
      %18 = arith.mulf %15, %17 : vector<8x32xf32>
      %19 = vector.extract_strided_slice %13 {offsets = [0, 1, 0], sizes = [8, 1, 32], strides = [1, 1, 1]} : vector<8x2x32xf32> to vector<8x1x32xf32>
      %20 = vector.shape_cast %19 : vector<8x1x32xf32> to vector<8x32xf32>
      %21 = vector.extract_strided_slice %12 {offsets = [0, 1], sizes = [8, 1], strides = [1, 1]} : vector<8x2xf32> to vector<8x1xf32>
      %22 = vector.broadcast %21 : vector<8x1xf32> to vector<8x32xf32>
      %23 = arith.mulf %20, %22 : vector<8x32xf32>
      %c0_19 = arith.constant 0 : index
      %c0_20 = arith.constant 0 : index
      %24 = vector.load %arg4[%c0_19, %c0_20] : memref<8x32xbf16, #tpu.memory_space<vmem>>, vector<8x32xbf16>
      %c0_21 = arith.constant 0 : index
      %c0_22 = arith.constant 0 : index
      %25 = vector.load %arg6[%c0_21, %c0_22] : memref<32x32xbf16, #tpu.memory_space<vmem>>, vector<32x32xbf16>
      %cst_23 = arith.constant dense<0.000000e+00> : vector<8x32xf32>
      %26 = tpu.matmul %24, %25, %cst_23 {dimension_numbers = #tpu.dot_dimension_numbers<[1], [0], [0], [1], [0, 0, 1, 1], [], []>} : vector<8x32xbf16>, vector<32x32xbf16>, vector<8x32xf32> -> vector<8x32xf32>
      %c0_24 = arith.constant 0 : index
      %c0_25 = arith.constant 0 : index
      %27 = vector.load %arg7[%c0_24, %c0_25] : memref<1x32xf32, #tpu.memory_space<vmem>>, vector<1x32xf32>
      %28 = vector.broadcast %27 : vector<1x32xf32> to vector<8x32xf32>
      %29 = arith.addf %26, %28 : vector<8x32xf32>
      %30 = math.tanh %29 : vector<8x32xf32>
      %31 = arith.truncf %18 : vector<8x32xf32> to vector<8x32xbf16>
      %c0_26 = arith.constant 0 : index
      %c0_27 = arith.constant 0 : index
      %32 = vector.load %arg8[%c0_26, %c0_27] : memref<32x32xbf16, #tpu.memory_space<vmem>>, vector<32x32xbf16>
      %cst_28 = arith.constant dense<0.000000e+00> : vector<8x32xf32>
      %33 = tpu.matmul %31, %32, %cst_28 {dimension_numbers = #tpu.dot_dimension_numbers<[1], [0], [0], [1], [0, 0, 1, 1], [], []>} : vector<8x32xbf16>, vector<32x32xbf16>, vector<8x32xf32> -> vector<8x32xf32>
      %c0_29 = arith.constant 0 : index
      %c0_30 = arith.constant 0 : index
      %34 = vector.load %arg9[%c0_29, %c0_30] : memref<1x32xf32, #tpu.memory_space<vmem>>, vector<1x32xf32>
      %35 = vector.broadcast %34 : vector<1x32xf32> to vector<8x32xf32>
      %36 = arith.addf %33, %35 : vector<8x32xf32>
      %37 = math.tanh %36 : vector<8x32xf32>
      %38 = arith.truncf %23 : vector<8x32xf32> to vector<8x32xbf16>
      %c0_31 = arith.constant 0 : index
      %c0_32 = arith.constant 0 : index
      %39 = vector.load %arg10[%c0_31, %c0_32] : memref<32x32xbf16, #tpu.memory_space<vmem>>, vector<32x32xbf16>
      %cst_33 = arith.constant dense<0.000000e+00> : vector<8x32xf32>
      %40 = tpu.matmul %38, %39, %cst_33 {dimension_numbers = #tpu.dot_dimension_numbers<[1], [0], [0], [1], [0, 0, 1, 1], [], []>} : vector<8x32xbf16>, vector<32x32xbf16>, vector<8x32xf32> -> vector<8x32xf32>
      %c0_34 = arith.constant 0 : index
      %c0_35 = arith.constant 0 : index
      %41 = vector.load %arg11[%c0_34, %c0_35] : memref<1x32xf32, #tpu.memory_space<vmem>>, vector<1x32xf32>
      %42 = vector.broadcast %41 : vector<1x32xf32> to vector<8x32xf32>
      %43 = arith.addf %40, %42 : vector<8x32xf32>
      %44 = math.tanh %43 : vector<8x32xf32>
      %c0_36 = arith.constant 0 : index
      %c0_37 = arith.constant 0 : index
      %45 = vector.load %arg17[%c0_36, %c0_37] : memref<8x32xf32, #tpu.memory_space<vmem>>, vector<8x32xf32>
      tpu.vector_store %arg17[%c0_36, %c0_37], %30 {strides = array<i32>} : memref<8x32xf32, #tpu.memory_space<vmem>>, vector<8x32xf32>,
      %c0_38 = arith.constant 0 : index
      %c0_39 = arith.constant 0 : index
      %46 = vector.load %arg18[%c0_38, %c0_39] : memref<8x32xf32, #tpu.memory_space<vmem>>, vector<8x32xf32>
      tpu.vector_store %arg18[%c0_38, %c0_39], %37 {strides = array<i32>} : memref<8x32xf32, #tpu.memory_space<vmem>>, vector<8x32xf32>,
      %c0_40 = arith.constant 0 : index
      %c0_41 = arith.constant 0 : index
      %47 = vector.load %arg19[%c0_40, %c0_41] : memref<8x32xf32, #tpu.memory_space<vmem>>, vector<8x32xf32>
      tpu.vector_store %arg19[%c0_40, %c0_41], %44 {strides = array<i32>} : memref<8x32xf32, #tpu.memory_space<vmem>>, vector<8x32xf32>,
      %48 = arith.truncf %30 : vector<8x32xf32> to vector<8x32xbf16>
      %c0_42 = arith.constant 0 : index
      %c0_43 = arith.constant 0 : index
      %49 = vector.load %arg12[%c0_42, %c0_43] : memref<32x128xbf16, #tpu.memory_space<vmem>>, vector<32x128xbf16>
      %cst_44 = arith.constant dense<0.000000e+00> : vector<8x128xf32>
      %50 = tpu.matmul %48, %49, %cst_44 {dimension_numbers = #tpu.dot_dimension_numbers<[1], [0], [0], [1], [0, 0, 1, 1], [], []>} : vector<8x32xbf16>, vector<32x128xbf16>, vector<8x128xf32> -> vector<8x128xf32>
      %51 = arith.truncf %37 : vector<8x32xf32> to vector<8x32xbf16>
      %c0_45 = arith.constant 0 : index
      %c0_46 = arith.constant 0 : index
      %52 = vector.load %arg13[%c0_45, %c0_46] : memref<32x128xbf16, #tpu.memory_space<vmem>>, vector<32x128xbf16>
      %cst_47 = arith.constant dense<0.000000e+00> : vector<8x128xf32>
      %53 = tpu.matmul %51, %52, %cst_47 {dimension_numbers = #tpu.dot_dimension_numbers<[1], [0], [0], [1], [0, 0, 1, 1], [], []>} : vector<8x32xbf16>, vector<32x128xbf16>, vector<8x128xf32> -> vector<8x128xf32>
      %54 = arith.addf %50, %53 : vector<8x128xf32>
      %55 = arith.truncf %44 : vector<8x32xf32> to vector<8x32xbf16>
      %c0_48 = arith.constant 0 : index
      %c0_49 = arith.constant 0 : index
      %56 = vector.load %arg14[%c0_48, %c0_49] : memref<32x128xbf16, #tpu.memory_space<vmem>>, vector<32x128xbf16>
      %cst_50 = arith.constant dense<0.000000e+00> : vector<8x128xf32>
      %57 = tpu.matmul %55, %56, %cst_50 {dimension_numbers = #tpu.dot_dimension_numbers<[1], [0], [0], [1], [0, 0, 1, 1], [], []>} : vector<8x32xbf16>, vector<32x128xbf16>, vector<8x128xf32> -> vector<8x128xf32>
      %58 = arith.addf %54, %57 : vector<8x128xf32>
      %c0_51 = arith.constant 0 : index
      %c0_52 = arith.constant 0 : index
      %59 = vector.load %arg15[%c0_51, %c0_52] : memref<1x128xf32, #tpu.memory_space<vmem>>, vector<1x128xf32>
      %60 = vector.broadcast %59 : vector<1x128xf32> to vector<8x128xf32>
      %61 = arith.addf %58, %60 : vector<8x128xf32>
      %c0_53 = arith.constant 0 : index
      %c0_54 = arith.constant 0 : index
      %62 = vector.load %arg16[%c0_53, %c0_54] : memref<8x128xf32, #tpu.memory_space<vmem>>, vector<8x128xf32>
      tpu.vector_store %arg16[%c0_53, %c0_54], %61 {strides = array<i32>} : memref<8x128xf32, #tpu.memory_space<vmem>>, vector<8x128xf32>,
    } else {
    }
    return
  }
  func.func @transform_0(%arg0: i32, %arg1: i32) -> (i32, i32, i32) {
    %c0_i32 = arith.constant 0 : i32
    %c0_i32_0 = arith.constant 0 : i32
    return %arg0, %arg1, %c0_i32 : i32, i32, i32
  }
  func.func @transform_1(%arg0: i32, %arg1: i32) -> (i32, i32, i32) {
    %c0_i32 = arith.constant 0 : i32
    %c0_i32_0 = arith.constant 0 : i32
    return %arg0, %c0_i32, %arg1 : i32, i32, i32
  }
  func.func @transform_2(%arg0: i32, %arg1: i32) -> (i32, i32) {
    %c0_i32 = arith.constant 0 : i32
    %c0_i32_0 = arith.constant 0 : i32
    return %arg0, %c0_i32 : i32, i32
  }
  func.func @transform_3(%arg0: i32, %arg1: i32) -> (i32, i32) {
    %c0_i32 = arith.constant 0 : i32
    %c0_i32_0 = arith.constant 0 : i32
    return %arg0, %c0_i32 : i32, i32
  }
  func.func @transform_4(%arg0: i32, %arg1: i32) -> (i32, i32) {
    %c0_i32 = arith.constant 0 : i32
    %c0_i32_0 = arith.constant 0 : i32
    %c0_i32_1 = arith.constant 0 : i32
    return %c0_i32, %c0_i32_0 : i32, i32
  }
  func.func @transform_5(%arg0: i32, %arg1: i32) -> (i32, i32) {
    %c0_i32 = arith.constant 0 : i32
    %c0_i32_0 = arith.constant 0 : i32
    %c0_i32_1 = arith.constant 0 : i32
    return %c0_i32, %c0_i32_0 : i32, i32
  }
  func.func @transform_6(%arg0: i32, %arg1: i32) -> (i32, i32) {
    %c0_i32 = arith.constant 0 : i32
    %c0_i32_0 = arith.constant 0 : i32
    %c0_i32_1 = arith.constant 0 : i32
    return %c0_i32, %c0_i32_0 : i32, i32
  }
  func.func @transform_7(%arg0: i32, %arg1: i32) -> (i32, i32) {
    %c0_i32 = arith.constant 0 : i32
    %c0_i32_0 = arith.constant 0 : i32
    %c0_i32_1 = arith.constant 0 : i32
    return %c0_i32, %c0_i32_0 : i32, i32
  }
  func.func @transform_8(%arg0: i32, %arg1: i32) -> (i32, i32) {
    %c0_i32 = arith.constant 0 : i32
    %c0_i32_0 = arith.constant 0 : i32
    %c0_i32_1 = arith.constant 0 : i32
    return %c0_i32, %c0_i32_0 : i32, i32
  }
  func.func @transform_9(%arg0: i32, %arg1: i32) -> (i32, i32) {
    %c0_i32 = arith.constant 0 : i32
    %c0_i32_0 = arith.constant 0 : i32
    %c0_i32_1 = arith.constant 0 : i32
    return %c0_i32, %c0_i32_0 : i32, i32
  }
  func.func @transform_10(%arg0: i32, %arg1: i32) -> (i32, i32) {
    %c0_i32 = arith.constant 0 : i32
    %c0_i32_0 = arith.constant 0 : i32
    %c0_i32_1 = arith.constant 0 : i32
    return %c0_i32, %c0_i32_0 : i32, i32
  }
  func.func @transform_11(%arg0: i32, %arg1: i32) -> (i32, i32) {
    %c0_i32 = arith.constant 0 : i32
    %c0_i32_0 = arith.constant 0 : i32
    %c0_i32_1 = arith.constant 0 : i32
    return %c0_i32, %c0_i32_0 : i32, i32
  }
  func.func @transform_12(%arg0: i32, %arg1: i32) -> (i32, i32) {
    %c0_i32 = arith.constant 0 : i32
    %c0_i32_0 = arith.constant 0 : i32
    %c0_i32_1 = arith.constant 0 : i32
    return %c0_i32, %c0_i32_0 : i32, i32
  }
  func.func @transform_13(%arg0: i32, %arg1: i32) -> (i32, i32) {
    %c0_i32 = arith.constant 0 : i32
    %c0_i32_0 = arith.constant 0 : i32
    %c0_i32_1 = arith.constant 0 : i32
    return %c0_i32, %c0_i32_0 : i32, i32
  }
  func.func @transform_14(%arg0: i32, %arg1: i32) -> (i32, i32) {
    %c0_i32 = arith.constant 0 : i32
    %c0_i32_0 = arith.constant 0 : i32
    return %arg0, %c0_i32 : i32, i32
  }
  func.func @transform_15(%arg0: i32, %arg1: i32) -> (i32, i32) {
    %c0_i32 = arith.constant 0 : i32
    %c0_i32_0 = arith.constant 0 : i32
    return %arg0, %c0_i32 : i32, i32
  }
  func.func @transform_16(%arg0: i32, %arg1: i32) -> (i32, i32) {
    %c0_i32 = arith.constant 0 : i32
    %c0_i32_0 = arith.constant 0 : i32
    return %arg0, %c0_i32 : i32, i32
  }
  func.func @transform_17(%arg0: i32, %arg1: i32) -> (i32, i32) {
    %c0_i32 = arith.constant 0 : i32
    %c0_i32_0 = arith.constant 0 : i32
    return %arg0, %c0_i32 : i32, i32
  }
}

</mosaic_0001>

<bundles_post_ra>
// kernel: tpu_custom_call.1
= control target key start
LH: loop header
LB: loop body
LE: loop exit
PB: predicated region body
PF: predicated region fallthrough
CT: control target
= control target key end

     0   :  { %s1960_s0 = inlined_call_operand.hbm [shape: bf16[8,8,32], index: 0, kind: input, shape index: {}]   ;;  %s1961_s1 = inlined_call_operand.hbm [shape: bf16[8,2,8], index: 1, kind: input, shape index: {}]   ;;  %s1962_s2 = inlined_call_operand.hbm [shape: bf16[8,32], index: 2, kind: input, shape index: {}]   ;;  %s1963_s3 = inlined_call_operand.vmem [shape: f32[8,2], index: 3, kind: input, shape index: {}]   ;;  %s1964_s4 = inlined_call_operand.vmem [shape: bf16[32,32], index: 4, kind: input, shape index: {}]   ;;  %s1965_s5 = inlined_call_operand.vmem [shape: f32[1,32], index: 5, kind: input, shape index: {}]   ;;  %s1966_s6 = inlined_call_operand.hbm [shape: bf16[32,32], index: 6, kind: input, shape index: {}]   ;;  %s1967_s7 = inlined_call_operand.vmem [shape: f32[1,32], index: 7, kind: input, shape index: {}]   ;;  %s1968_s8 = inlined_call_operand.hbm [shape: bf16[32,32], index: 8, kind: input, shape index: {}]   ;;  %s1969_s9 = inlined_call_operand.vmem [shape: f32[1,32], index: 9, kind: input, shape index: {}]   ;;  %s1970_s10 = inlined_call_operand.hbm [shape: bf16[32,128], index: 10, kind: input, shape index: {}]   ;;  %s1971_s11 = inlined_call_operand.hbm [shape: bf16[32,128], index: 11, kind: input, shape index: {}]   ;;  %s1972_s12 = inlined_call_operand.hbm [shape: bf16[32,128], index: 12, kind: input, shape index: {}]   ;;  %s1973_s13 = inlined_call_operand.vmem [shape: f32[1,128], index: 13, kind: input, shape index: {}]   ;;  %s1974_s14 = inlined_call_operand.hbm [shape: f32[8,128], index: 14, kind: output, shape index: {0}]   ;;  %s1975_s15 = inlined_call_operand.hbm [shape: f32[8,32], index: 15, kind: output, shape index: {1}]   ;;  %s1976_s16 = inlined_call_operand.hbm [shape: f32[8,32], index: 16, kind: output, shape index: {2}]   ;;  %s1977_s17 = inlined_call_operand.hbm [shape: f32[8,32], index: 17, kind: output, shape index: {3}]  }
   0x1   :  { %1978 = sst [smem:[#allocation31_spill]] %s1960_s0 }
   0x2   :  { %1979 = sst [smem:[#allocation32_spill]] %s1961_s1 }
   0x3   :  { %23 = vsyncpa [#allocation4], 0 }
   0x4   :  { %24 = vsyncpa [#allocation7], 0 }
   0x5   :  { %25 = vsyncpa [#allocation10], 0 }
   0x6   :  { %26 = vsyncpa [#allocation13], 0 }
   0x7   :  { %27 = vsyncpa [#allocation16], 0 }
   0x8   :  { %28 = vsyncpa [#allocation5], 0 }
   0x9   :  { %29 = vsyncpa [#allocation19], 0 }
   0xa   :  { %30 = vsyncpa [#allocation22], 0  ;;  %s1648_s24 = smov [#allocation6]  }
   0xb   :  { %s48_s25 = sshll.u32 %s1648_s24, 4  ;;  %s49_s25 = int_to_ptr.vmem [resolvable:$true] %s48_s25 }
   0xc   :  { %s1400_s26 = scalar_lea.vmem %s49_s25, 128  ;;  %p1405_p1 = scmp.lt.s32.totalorder %s49_s25, %s49_s25 }
   0xd   :  { %p1401_p0 = scmp.ne.s32.totalorder %s49_s25, %s1400_s26  ;;  %p1406_p2 = scmp.lt.s32.totalorder %s1400_s26, %s1400_s26 }
   0xf   :  { %p1407_p3 = por %p1406_p2, %p1405_p1 }
  0x11   :  { %p1408_p4 = pnand %p1407_p3, %p1401_p0 }
  0x13   :  { %1411 = shalt.err (!%p1408_p4)
}
  0x14   :  { %s1649_s27 = smov 16   ;;  %s1650_s28 = smov 1  }
  0x15   :  { %s1980_s30 = sld [smem:[#allocation32_spill]]  ;;  %s1651_s18 = smov [#allocation9]  }
  0x16   :  { %s76_s19 = sshll.u32 %s1651_s18, 4  ;;  %s1652_s1 = smov [#allocation12]   ;;  %s77_s19 = int_to_ptr.vmem [resolvable:$true] %s76_s19 }
  0x17   :  { %s104_s20 = sshll.u32 %s1652_s1, 4  ;;  %s1420_s21 = scalar_lea.vmem %s77_s19, 256  ;;  %s105_s20 = int_to_ptr.vmem [resolvable:$true] %s104_s20 }
  0x18   :  { %p1421_p5 = scmp.ne.s32.totalorder %s77_s19, %s1420_s21  ;;  %p1425_p6 = scmp.lt.s32.totalorder %s77_s19, %s77_s19 }
  0x19   :  { %p1426_p7 = scmp.lt.s32.totalorder %s1420_s21, %s1420_s21 }
  0x1b   :  { %54 = dma.hbm_to_vmem [thread:$0]  %s1980_s30, 128, %s49_s25, [#allocation7], %s1649_s27, %s1649_s27, %s1650_s28  }
  0x1c   :  { %p1427_p8 = por %p1426_p7, %p1425_p6 }
  0x1e   :  { %p1428_p9 = pnand %p1427_p8, %p1421_p5 }
  0x20   :  { %1431 = shalt.err (!%p1428_p9)
}
  0x21   :  { %s1653_s22 = smov 64   ;;  %s1654_s23 = smov 4  }
  0x22   :  { %82 = dma.hbm_to_vmem [thread:$0]  %s1966_s6, 256, %s77_s19, [#allocation10], %s1653_s22, %s1653_s22, %s1654_s23  }
  0x23   :  { %s1440_s25 = scalar_lea.vmem %s105_s20, 256  ;;  %p1445_p11 = scmp.lt.s32.totalorder %s105_s20, %s105_s20 }
  0x24   :  { %p1441_p10 = scmp.ne.s32.totalorder %s105_s20, %s1440_s25  ;;  %p1446_p12 = scmp.lt.s32.totalorder %s1440_s25, %s1440_s25 }
  0x26   :  { %p1447_p13 = por %p1446_p12, %p1445_p11 }
  0x28   :  { %p1448_p0 = pnand %p1447_p13, %p1441_p10 }
  0x2a   :  { %1451 = shalt.err (!%p1448_p0)
}
  0x2b   :  { %110 = dma.hbm_to_vmem [thread:$0]  %s1970_s10, 256, %s105_s20, [#allocation13], %s1653_s22, %s1653_s22, %s1654_s23  }
  0x2c   :  { %s1655_s29 = smov [#allocation3]   ;;  %s1656_s30 = smov [#allocation8]  }
  0x2d   :  { %s36_s0 = sshll.u32 %s1655_s29, 4  ;;  %s61_s6 = sshll.u32 %s1656_s30, 4  ;;  %s37_s0 = int_to_ptr.vmem [resolvable:$true] %s36_s0  ;;  %s62_s6 = int_to_ptr.vmem [resolvable:$true] %s61_s6 }
  0x2e   :  { %s1460_s18 = scalar_lea.vmem %s37_s0, 512  ;;  %p1465_p2 = scmp.lt.s32.totalorder %s37_s0, %s37_s0 }
  0x2f   :  { %p1461_p1 = scmp.ne.s32.totalorder %s37_s0, %s1460_s18  ;;  %p1466_p3 = scmp.lt.s32.totalorder %s1460_s18, %s1460_s18 }
  0x31   :  { %p1467_p4 = por %p1466_p3, %p1465_p2 }
  0x33   :  { %p1468_p5 = pnand %p1467_p4, %p1461_p1 }
  0x35   :  { %1471 = shalt.err (!%p1468_p5)
}
  0x36   :  { %s1981_s21 = sld [smem:[#allocation31_spill]]  ;;  %s1480_s10 = scalar_lea.vmem %s62_s6, 64 }
  0x37   :  { %p1481_p6 = scmp.ne.s32.totalorder %s62_s6, %s1480_s10  ;;  %p1485_p7 = scmp.lt.s32.totalorder %s62_s6, %s62_s6 }
  0x38   :  { %p1486_p8 = scmp.lt.s32.totalorder %s1480_s10, %s1480_s10 }
  0x3a   :  { %p1487_p9 = por %p1486_p8, %p1485_p7 }
  0x3c   :  { %42 = dma.hbm_to_vmem [thread:$0]  %s1981_s21, 512, %s37_s0, [#allocation4], %s1653_s22, %s1653_s22, %s1654_s23  }
  0x3d   :  { %p1488_p10 = pnand %p1487_p9, %p1481_p6 }
  0x3f   :  { %1491 = shalt.err (!%p1488_p10)
}
  0x40   :  { %64 = dma.hbm_to_vmem [thread:$0]  %s1962_s2, 64, %s62_s6, [#allocation7]  }
  0x41   :  { %s1657_s26 = smov [#allocation11]   ;;  %s1658_s27 = smov [#allocation14]  }
  0x42   :  { %s90_s25 = sshll.u32 %s1657_s26, 4  ;;  %s116_s28 = sshll.u32 %s1658_s27, 4  ;;  %s91_s25 = int_to_ptr.vmem [resolvable:$true] %s90_s25  ;;  %s117_s28 = int_to_ptr.vmem [resolvable:$true] %s116_s28 }
  0x43   :  { %s1500_s29 = scalar_lea.vmem %s91_s25, 256  ;;  %p1505_p12 = scmp.lt.s32.totalorder %s91_s25, %s91_s25 }
  0x44   :  { %p1501_p11 = scmp.ne.s32.totalorder %s91_s25, %s1500_s29  ;;  %p1506_p13 = scmp.lt.s32.totalorder %s1500_s29, %s1500_s29 }
  0x46   :  { %p1507_p0 = por %p1506_p13, %p1505_p12 }
  0x48   :  { %p1508_p1 = pnand %p1507_p0, %p1501_p11 }
  0x4a   :  { %1511 = shalt.err (!%p1508_p1)
}
  0x4b   :  { %96 = dma.hbm_to_vmem [thread:$0]  %s1968_s8, 256, %s91_s25, [#allocation10], %s1653_s22, %s1653_s22, %s1654_s23  }
  0x4c   :  { %s1520_s2 = scalar_lea.vmem %s117_s28, 256  ;;  %p1525_p3 = scmp.lt.s32.totalorder %s117_s28, %s117_s28 }
  0x4d   :  { %p1521_p2 = scmp.ne.s32.totalorder %s117_s28, %s1520_s2  ;;  %p1526_p4 = scmp.lt.s32.totalorder %s1520_s2, %s1520_s2 }
  0x4f   :  { %p1527_p5 = por %p1526_p4, %p1525_p3 }
  0x51   :  { %p1528_p6 = pnand %p1527_p5, %p1521_p2 }
  0x53   :  { %1531 = shalt.err (!%p1528_p6)
}
  0x54   :  { %122 = dma.hbm_to_vmem [thread:$0]  %s1971_s11, 256, %s117_s28, [#allocation13], %s1653_s22, %s1653_s22, %s1654_s23  }
  0x55   :  { %s1659_s19 = smov [#allocation15]  }
  0x56   :  { %s128_s1 = sshll.u32 %s1659_s19, 4  ;;  %s129_s1 = int_to_ptr.vmem [resolvable:$true] %s128_s1 }
  0x57   :  { %s1540_s21 = scalar_lea.vmem %s129_s1, 256  ;;  %p1545_p8 = scmp.lt.s32.totalorder %s129_s1, %s129_s1 }
  0x58   :  { %p1541_p7 = scmp.ne.s32.totalorder %s129_s1, %s1540_s21  ;;  %p1546_p9 = scmp.lt.s32.totalorder %s1540_s21, %s1540_s21 }
  0x5a   :  { %p1547_p10 = por %p1546_p9, %p1545_p8 }
  0x5c   :  { %p1548_p11 = pnand %p1547_p10, %p1541_p7 }
  0x5e   :  { %1551 = shalt.err (!%p1548_p11)
}
  0x5f   :  { %134 = dma.hbm_to_vmem [thread:$0]  %s1972_s12, 256, %s129_s1, [#allocation16], %s1653_s22, %s1653_s22, %s1654_s23  }
  0x60   :  { %1632 = dma.done.wait [#allocation4], 512  }
  0x61   :  { %1633 = vsyncadd [#allocation4], 4294966784 }
  0x62   :  { %1634 = dma.done.wait [#allocation7], 192  }
  0x63   :  { %1635 = vsyncadd [#allocation7], 4294967104 }
  0x64   :  { %1636 = dma.done.wait [#allocation10], 512  }
  0x65   :  { %1637 = vsyncadd [#allocation10], 4294966784 }
  0x66   :  { %1638 = dma.done.wait [#allocation13], 512  }
  0x67   :  { %1639 = vsyncadd [#allocation13], 4294966784 }
  0x68   :  { %1640 = dma.done.wait [#allocation16], 256  }
  0x69   :  { %1641 = vsyncadd [#allocation16], 4294967040  ;;  %v1660_v0 = vmov 0.0   ;;  %vm166_vm0 = vcmask 254976   ;;  %vm1661_vm1 = vmmov 0   ;;  %v1662_v1 = vmov 0  }
  0x6a   :  { %1256 = vmatprep.subr.bf16.mxu0 %v1660_v0  ;;  %1262 = vmatprep.subr.bf16.mxu1 %v1660_v0  ;;  %167 = vst.msk [vmem:[#allocation2] sm:$0x3] %vm166_vm0, %v1660_v0  ;;  %168 = vst.msk [vmem:[#allocation2 + $0x2] sm:$0x3] %vm166_vm0, %v1660_v0  ;;  %vm203_vm2 = vcmask 1043456   ;;  %vm199_vm3 = vcmask 64512  }
  0x6b   :  { %1258 = vmatprep.mubr.msk.bf16.mxu0 %vm1661_vm1, %v1660_v0  ;;  %1264 = vmatprep.mubr.msk.bf16.mxu1 %vm1661_vm1, %v1660_v0  ;;  %169 = vst.msk [vmem:[#allocation2 + $0x4] sm:$0x3] %vm166_vm0, %v1660_v0  ;;  %170 = vst.msk [vmem:[#allocation2 + $0x6] sm:$0x3] %vm166_vm0, %v1660_v0  ;;  %v191_v2 = vld [vmem:[#allocation3] sm:$0xf] }
  0x6c   :  { %171 = vst.msk [vmem:[#allocation2 + $0x8] sm:$0x3] %vm166_vm0, %v1660_v0  ;;  %172 = vst.msk [vmem:[#allocation2 + $0xa] sm:$0x3] %vm166_vm0, %v1660_v0  ;;  %1372 = vset.pattern.permute.xlu0 %v1662_v1  ;;  %v192_v3 = vld [vmem:[#allocation3 + $0x4] sm:$0xf] }
  0x6d   :  { %173 = vst.msk [vmem:[#allocation2 + $0xc] sm:$0x3] %vm166_vm0, %v1660_v0  ;;  %174 = vst.msk [vmem:[#allocation2 + $0xe] sm:$0x3] %vm166_vm0, %v1660_v0  ;;  %v205_v4 = vsel %vm203_vm2, %v191_v2, 0  ;;  %v251_v5 = vsel %vm203_vm2, %v192_v3, 0 }
  0x6e   :  { %v183_v6 = vld [vmem:[#allocation6] sm:$0x1]  ;;  %v193_v7 = vld [vmem:[#allocation3 + $0x8] sm:$0xf]  ;;  %1257 = vmatpush3.bf16.msra.mxu0 %v205_v4  ;;  %1263 = vmatpush3.bf16.msra.mxu1 %v251_v5  ;;  %v184_v8 = vld [vmem:[#allocation6 + $0x1] sm:$0x1] }
  0x6f   :  { %v194_v9 = vld [vmem:[#allocation3 + $0xc] sm:$0xf]  ;;  %v589_v10 = vld [vmem:[%s1963_s3] sm:$0xff]  ;;  %1268 = vmatprep.subr.bf16.mxu0 %v1660_v0  ;;  %v297_v11 = vsel %vm203_vm2, %v193_v7, 0  ;;  %1274 = vmatprep.subr.bf16.mxu1 %v1660_v0  ;;  %v185_v17 = vld [vmem:[#allocation6 + $0x2] sm:$0x1] }
  0x70   :  { %v343_v12 = vsel %vm203_vm2, %v194_v9, 0  ;;  %v195_v13 = vld [vmem:[#allocation3 + $0x10] sm:$0xf]  ;;  %v196_v14 = vld [vmem:[#allocation3 + $0x14] sm:$0xf]  ;;  %600 = vperm.xlu0 %1372, %v589_v10   ;;  %v1663_v19 = vmov 1  }
  0x71   :  { %1259 = vmatmul.mubr.msk.bf16.vlgmr.msra.gmra.mxu0 %vm199_vm3, %v183_v6  ;;  %1265 = vmatmul.mubr.msk.bf16.vlgmr.msra.gmra.mxu1 %vm199_vm3, %v184_v8  ;;  %v389_v15 = vsel %vm203_vm2, %v195_v13, 0  ;;  %v435_v16 = vsel %vm203_vm2, %v196_v14, 0  ;;  %v186_v18 = vld [vmem:[#allocation6 + $0x3] sm:$0x1]  ;;  %v197_v20 = vld [vmem:[#allocation3 + $0x18] sm:$0xf] }
  0x72   :  { %1269 = vmatpush3.bf16.msra.mxu0 %v297_v11  ;;  %1275 = vmatpush3.bf16.msra.mxu1 %v343_v12  ;;  %v198_v21 = vld [vmem:[#allocation3 + $0x1c] sm:$0xf]  ;;  %v187_v22 = vld [vmem:[#allocation6 + $0x4] sm:$0x1]  ;;  %v188_v23 = vld [vmem:[#allocation6 + $0x5] sm:$0x1] }
  0x73   :  { %1270 = vmatprep.mubr.msk.bf16.mxu0 %vm1661_vm1, %v1660_v0  ;;  %1276 = vmatprep.mubr.msk.bf16.mxu1 %vm1661_vm1, %v1660_v0  ;;  %v481_v24 = vsel %vm203_vm2, %v197_v20, 0  ;;  %v527_v25 = vsel %vm203_vm2, %v198_v21, 0  ;;  %v189_v26 = vld [vmem:[#allocation6 + $0x6] sm:$0x1]  ;;  %v190_v27 = vld [vmem:[#allocation6 + $0x7] sm:$0x1] }
  0x74   :  { %1280 = vmatprep.subr.bf16.mxu0 %v1660_v0  ;;  %1286 = vmatprep.subr.bf16.mxu1 %v1660_v0  ;;  %v1374_v28 = vld [vmem:[%s1964_s4 + $0x8] sm:$0xff]   ;;  %v1375_v30 = vld [vmem:[%s1964_s4] sm:$0xff]   ;;  %v651_v32 = vld [vmem:[#allocation8] sm:$0xf]  ;;  %vm675_vm4 = vcmask 261120   ;;  %vm756_vm5 = vcmask 1041409  }
  0x75   :  { %1373 = vset.pattern.permute.xlu0 %v1663_v19  ;;  %v1376_v29 = vld [vmem:[#allocation9 + $0x8] sm:$0xff]   ;;  %v1378_v31 = vld [vmem:[#allocation9] sm:$0xff]   ;;  %v1377_v33 = vld [vmem:[#allocation11 + $0x8] sm:$0xff]   ;;  %vm759_vm6 = vcmask 1042434   ;;  %vm762_vm7 = vcmask 1043459   ;;  %vm765_vm8 = vcmask 1044484  }
  0x76   :  { %626 = vperm.xlu0 %1373, %v589_v10   ;;  %v1379_v34 = vld [vmem:[#allocation11] sm:$0xff]   ;;  %v175_v35 = vld [vmem:[#allocation2] sm:$0x3]  ;;  %v176_v36 = vld [vmem:[#allocation2 + $0x2] sm:$0x3]  ;;  %vm768_vm9 = vcmask 1045509  }
  0x77   :  { %v177_v48 = vld [vmem:[#allocation2 + $0x4] sm:$0x3]  ;;  %v178_v49 = vld [vmem:[#allocation2 + $0x6] sm:$0x3]  ;;  %v179_v2 = vld [vmem:[#allocation2 + $0x8] sm:$0x3] }
  0x78   :  { %v180_v3 = vld [vmem:[#allocation2 + $0xa] sm:$0x3]  ;;  %vm771_vm10 = vcmask 1046534   ;;  %vm774_vm11 = vcmask 1047559  }
  0x79   :  { %1271 = vmatmul.mubr.msk.bf16.vlgmr.msra.gmra.mxu0 %vm199_vm3, %v185_v17  ;;  %1277 = vmatmul.mubr.msk.bf16.vlgmr.msra.gmra.mxu1 %vm199_vm3, %v186_v18 }
  0x7a   :  { %1281 = vmatpush3.bf16.msra.mxu0 %v389_v15  ;;  %1287 = vmatpush3.bf16.msra.mxu1 %v435_v16 }
  0x7b   :  { %1282 = vmatprep.mubr.msk.bf16.mxu0 %vm1661_vm1, %v1660_v0  ;;  %1288 = vmatprep.mubr.msk.bf16.mxu1 %vm1661_vm1, %v1660_v0 }
  0x7c   :  { %1292 = vmatprep.subr.bf16.mxu0 %v1660_v0  ;;  %1298 = vmatprep.subr.bf16.mxu1 %v1660_v0 }
  0x81   :  { %1283 = vmatmul.mubr.msk.bf16.vlgmr.msra.gmra.mxu0 %vm199_vm3, %v187_v22  ;;  %1289 = vmatmul.mubr.msk.bf16.vlgmr.msra.gmra.mxu1 %vm199_vm3, %v188_v23 }
  0x82   :  { %1293 = vmatpush3.bf16.msra.mxu0 %v481_v24  ;;  %1299 = vmatpush3.bf16.msra.mxu1 %v527_v25 }
  0x83   :  { %1294 = vmatprep.mubr.msk.bf16.mxu0 %vm1661_vm1, %v1660_v0  ;;  %1300 = vmatprep.mubr.msk.bf16.mxu1 %vm1661_vm1, %v1660_v0 }
  0x84   :  { %1304 = vmatprep.subr.bf16.mxu0 %v1660_v0  ;;  %1312 = vmatprep.subr.bf16.mxu1 %v1660_v0 }
  0x89   :  { %1295 = vmatmul.mubr.msk.bf16.vlgmr.msra.gmra.mxu0 %vm199_vm3, %v189_v26  ;;  %1301 = vmatmul.mubr.msk.bf16.vlgmr.msra.gmra.mxu1 %vm199_vm3, %v190_v27 }
  0x8a   :  { %1308 = vmatprep.mubr.msk.bf16.mxu0 %vm1661_vm1, %v1660_v0  ;;  %1316 = vmatprep.mubr.msk.bf16.mxu1 %vm1661_vm1, %v1660_v0 }
  0x8b   :  { %1305 = vmatpush3.bf16.msra.mxu0 %v1374_v28  ;;  %1313 = vmatpush3.bf16.msra.mxu1 %v1376_v29 }
  0x8c   :  { %1306 = vmatprep.subr.bf16.mxu0 %v1660_v0  ;;  %1314 = vmatprep.subr.bf16.mxu1 %v1660_v0 }
  0x8f   :  { %1307 = vmatpush3.bf16.msra.mxu0 %v1375_v30  ;;  %1315 = vmatpush3.bf16.msra.mxu1 %v1378_v31  ;;  %v181_v31 = vld [vmem:[#allocation2 + $0xc] sm:$0x3] }
  0x90   :  { %1320 = vmatprep.subr.bf16.mxu0 %v1660_v0  ;;  %1328 = vmatprep.subr.bf16.mxu1 %v1660_v0 }
  0x92   :  { %1309 = vmatmul.mubr.msk.bf16.vlgmr.msra.gmra.mxu0 %vm675_vm4, %v651_v32  ;;  %v182_v32 = vld [vmem:[#allocation2 + $0xe] sm:$0x3] }
  0x93   :  { %1321 = vmatpush3.bf16.msra.mxu0 %v1377_v33  ;;  %1324 = vmatprep.mubr.msk.bf16.mxu0 %vm1661_vm1, %v1660_v0 }
  0x94   :  { %1322 = vmatprep.subr.bf16.mxu0 %v1660_v0 }
  0x97   :  { %1323 = vmatpush3.bf16.msra.mxu0 %v1379_v34 }
  0x98   :  { %1336 = vmatprep.subr.bf16.mxu0 %v1660_v0 }
  0xeb   :  { %v1882_v43 = vpop.permute.xlu0 %600 }
  0xec   :  { %v602_v57 = vrot.slane %v1882_v43, 1  ;;  %v603_v4 = vrot.slane %v1882_v43, 2  ;;  %v604_v5 = vrot.slane %v1882_v43, 3  ;;  %v605_v34 = vrot.slane %v1882_v43, 4 }
  0xf1   :  { %v1884_v52 = vpop.permute.xlu0 %626 }
  0xf2   :  { %v628_v58 = vrot.slane %v1884_v52, 7  ;;  %v629_v7 = vrot.slane %v1884_v52, 1  ;;  %v630_v11 = vrot.slane %v1884_v52, 2 }
 0x131   :  { %v241_v37 = vpop.f32.mrf.mxu0  ;;  %v287_v38 = vpop.f32.mrf.mxu1 }
 0x132   :  { %v569_v39 = vadd.f32 %v241_v37, %v175_v35  ;;  %v570_v40 = vadd.f32 %v287_v38, %v176_v36  ;;  %v606_v35 = vrot.slane %v1882_v43, 5  ;;  %v631_v36 = vrot.slane %v1884_v52, 3 }
 0x133   :  { %v1260_v41 = vpop.f32.mrf.mxu0  ;;  %v1266_v42 = vpop.f32.mrf.mxu1  ;;  %v632_v38 = vrot.slane %v1884_v52, 4 }
 0x134   :  { %578 = vst.msk [vmem:[#allocation2] sm:$0x3] %vm166_vm0, %v569_v39  ;;  %579 = vst.msk [vmem:[#allocation2 + $0x2] sm:$0x3] %vm166_vm0, %v570_v40 }
 0x135   :  { %v244_v44 = vpop.f32.mrf.mxu0  ;;  %v290_v45 = vpop.f32.mrf.mxu1 }
 0x137   :  { %v1261_v46 = vpop.f32.mrf.mxu0  ;;  %v1267_v47 = vpop.f32.mrf.mxu1 }
 0x139   :  { %v333_v50 = vpop.f32.mrf.mxu0  ;;  %v379_v51 = vpop.f32.mrf.mxu1 }
 0x13a   :  { %v571_v53 = vadd.f32 %v333_v50, %v177_v48  ;;  %v572_v54 = vadd.f32 %v379_v51, %v178_v49 }
 0x13b   :  { %v1272_v55 = vpop.f32.mrf.mxu0  ;;  %v1278_v56 = vpop.f32.mrf.mxu1  ;;  %v590_v61 = vld [vmem:[#allocation2] sm:$0x3]  ;;  %v591_v62 = vld [vmem:[#allocation2 + $0x2] sm:$0x3] }
 0x13c   :  { %580 = vst.msk [vmem:[#allocation2 + $0x4] sm:$0x3] %vm166_vm0, %v571_v53  ;;  %581 = vst.msk [vmem:[#allocation2 + $0x6] sm:$0x3] %vm166_vm0, %v572_v54  ;;  %v618_v6 = vmul.f32 %v602_v57, %v591_v62  ;;  %v643_v8 = vmul.f32 %v628_v58, %v590_v61  ;;  %v644_v18 = vmul.f32 %v1884_v52, %v591_v62 }
 0x13d   :  { %v336_v59 = vpop.f32.mrf.mxu0  ;;  %v382_v60 = vpop.f32.mrf.mxu1  ;;  %v617_v28 = vmul.f32 %v1882_v43, %v590_v61 }
 0x13e   :  { %v721_v20 = vpack.c.bf16 %v618_v6, %v618_v6  ;;  %v833_v21 = vpack.c.bf16 %v643_v8, %v643_v8  ;;  %v834_v37 = vpack.c.bf16 %v644_v18, %v644_v18 }
 0x13f   :  { %v1273_v63 = vpop.f32.mrf.mxu0  ;;  %v1279_v1 = vpop.f32.mrf.mxu1  ;;  %v720_v49 = vpack.c.bf16 %v617_v28, %v617_v28 }
 0x140   :  { %v748_v39 = vunpack.c.l.b16 %v721_v20  ;;  %v860_v40 = vunpack.c.l.b16 %v833_v21  ;;  %v861_v56 = vunpack.c.l.b16 %v834_v37  ;;  %v608_v20 = vrot.slane %v1882_v43, 7 }
 0x141   :  { %v425_v9 = vpop.f32.mrf.mxu0  ;;  %v471_v10 = vpop.f32.mrf.mxu1 }
 0x142   :  { %v573_v12 = vadd.f32 %v425_v9, %v179_v2  ;;  %v574_v13 = vadd.f32 %v471_v10, %v180_v3  ;;  %v755_v60 = vrot.slane %v748_v39, 7  ;;  %v868_v61 = vrot.slane %v860_v40, 1 }
 0x143   :  { %v1284_v14 = vpop.f32.mrf.mxu0  ;;  %v1290_v15 = vpop.f32.mrf.mxu1  ;;  %v592_v16 = vld [vmem:[#allocation2 + $0x4] sm:$0x3]  ;;  %v593_v17 = vld [vmem:[#allocation2 + $0x6] sm:$0x3] }
 0x144   :  { %582 = vst.msk [vmem:[#allocation2 + $0x8] sm:$0x3] %vm166_vm0, %v573_v12  ;;  %583 = vst.msk [vmem:[#allocation2 + $0xa] sm:$0x3] %vm166_vm0, %v574_v13  ;;  %v619_v19 = vmul.f32 %v603_v4, %v592_v16  ;;  %v620_v24 = vmul.f32 %v604_v5, %v593_v17  ;;  %v645_v25 = vmul.f32 %v629_v7, %v592_v16  ;;  %v747_v7 = vunpack.c.l.b16 %v720_v49 }
 0x145   :  { %v428_v22 = vpop.f32.mrf.mxu0  ;;  %v474_v23 = vpop.f32.mrf.mxu1  ;;  %v646_v27 = vmul.f32 %v630_v11, %v593_v17  ;;  %v633_v13 = vrot.slane %v1884_v52, 5  ;;  %v607_v16 = vrot.slane %v1882_v43, 6  ;;  %v634_v17 = vrot.slane %v1884_v52, 6 }
 0x146   :  { %v722_v26 = vpack.c.bf16 %v619_v19, %v619_v19  ;;  %v835_v33 = vpack.c.bf16 %v645_v25, %v645_v25  ;;  %v723_v44 = vpack.c.bf16 %v620_v24, %v620_v24  ;;  %v757_v18 = vsel %vm756_vm5, %v755_v60, %v747_v7  ;;  %v1382_v7 = vld [vmem:[#allocation14 + $0x8] sm:$0xff]  }
 0x147   :  { %v1285_v29 = vpop.f32.mrf.mxu0  ;;  %v1291_v30 = vpop.f32.mrf.mxu1  ;;  %v836_v48 = vpack.c.bf16 %v646_v27, %v646_v27  ;;  %v869_v21 = vsel %vm756_vm5, %v861_v56, %v868_v61  ;;  %v1200_v61 = vld [vmem:[%s1965_s5] ss:$0 sm:$0xff] }
 0x148   :  { %v749_v47 = vunpack.c.l.b16 %v722_v26  ;;  %v862_v55 = vunpack.c.l.b16 %v835_v33  ;;  %v750_v1 = vunpack.c.l.b16 %v723_v44 }
 0x149   :  { %v517_v41 = vpop.f32.mrf.mxu0  ;;  %v563_v42 = vpop.f32.mrf.mxu1  ;;  %v863_v6 = vunpack.c.l.b16 %v836_v48 }
 0x14a   :  { %v575_v45 = vadd.f32 %v517_v41, %v181_v31  ;;  %v576_v46 = vadd.f32 %v563_v42, %v182_v32  ;;  %v758_v4 = vrot.slane %v749_v47, 6  ;;  %v870_v12 = vrot.slane %v862_v55, 7 }
 0x14b   :  { %v1296_v50 = vpop.f32.mrf.mxu0  ;;  %v1302_v51 = vpop.f32.mrf.mxu1  ;;  %v594_v53 = vld [vmem:[#allocation2 + $0x8] sm:$0x3]  ;;  %v595_v54 = vld [vmem:[#allocation2 + $0xa] sm:$0x3]  ;;  %v761_v19 = vrot.slane %v750_v1, 5  ;;  %v872_v23 = vrot.slane %v863_v6, 6 }
 0x14c   :  { %584 = vst.msk [vmem:[#allocation2 + $0xc] sm:$0x3] %vm166_vm0, %v575_v45  ;;  %585 = vst.msk [vmem:[#allocation2 + $0xe] sm:$0x3] %vm166_vm0, %v576_v46  ;;  %v621_v57 = vmul.f32 %v605_v34, %v594_v53  ;;  %v622_v58 = vmul.f32 %v606_v35, %v595_v54  ;;  %v647_v59 = vmul.f32 %v631_v36, %v594_v53  ;;  %v1381_v6 = vld [vmem:[#allocation12] sm:$0xff]  }
 0x14d   :  { %v520_v62 = vpop.f32.mrf.mxu0  ;;  %v566_v63 = vpop.f32.mrf.mxu1  ;;  %v648_v2 = vmul.f32 %v632_v38, %v595_v54  ;;  %v760_v22 = vsel %vm759_vm6, %v758_v4, %v757_v18  ;;  %v871_v29 = vsel %vm759_vm6, %v870_v12, %v869_v21  ;;  %v1380_v4 = vld [vmem:[#allocation12 + $0x8] sm:$0xff]  }
 0x14e   :  { %v724_v3 = vpack.c.bf16 %v621_v57, %v621_v57  ;;  %v837_v5 = vpack.c.bf16 %v647_v59, %v647_v59  ;;  %v725_v10 = vpack.c.bf16 %v622_v58, %v622_v58  ;;  %v763_v33 = vsel %vm762_vm7, %v761_v19, %v760_v22 }
 0x14f   :  { %v1297_v8 = vpop.f32.mrf.mxu0  ;;  %v1303_v9 = vpop.f32.mrf.mxu1  ;;  %v838_v11 = vpack.c.bf16 %v648_v2, %v648_v2  ;;  %v873_v37 = vsel %vm762_vm7, %v872_v23, %v871_v29  ;;  %v1384_v23 = vld [vmem:[#allocation15 + $0x8] sm:$0xff]  }
 0x150   :  { %v751_v14 = vunpack.c.l.b16 %v724_v3  ;;  %v864_v15 = vunpack.c.l.b16 %v837_v5  ;;  %v752_v26 = vunpack.c.l.b16 %v725_v10  ;;  %v1383_v9 = vld [vmem:[#allocation14] sm:$0xff]   ;;  %v1204_v10 = vld [vmem:[%s1967_s7] ss:$0 sm:$0xff]  ;;  %s1664_s7 = smov [#allocation18]  }
 0x151   :  { %v865_v28 = vunpack.c.l.b16 %v838_v11  ;;  %v1208_v11 = vld [vmem:[%s1969_s9] ss:$0 sm:$0xff]  ;;  %s1148_s9 = sshll.u32 %s1664_s7, 4  ;;  %s1149_s9 = int_to_ptr.vmem [resolvable:$true] %s1148_s9 }
 0x152   :  { %v764_v27 = vrot.slane %v751_v14, 4  ;;  %v874_v32 = vrot.slane %v864_v15, 5  ;;  %v767_v39 = vrot.slane %v752_v26, 3  ;;  %v713_v62 = vpop.f32.mrf.mxu0  ;;  %v1385_v26 = vld [vmem:[#allocation15] sm:$0xff]   ;;  %s1552_s28 = scalar_lea.vmem %s1149_s9, 128  ;;  %p1557_p13 = scmp.lt.s32.totalorder %s1149_s9, %s1149_s9 }
 0x153   :  { %v596_v24 = vld [vmem:[#allocation2 + $0xc] sm:$0x3]  ;;  %v597_v25 = vld [vmem:[#allocation2 + $0xe] sm:$0x3]  ;;  %v876_v41 = vrot.slane %v865_v28, 4  ;;  %v714_v63 = vadd.f32 %v1200_v61, %v713_v62  ;;  %p1553_p12 = scmp.ne.s32.totalorder %s1149_s9, %s1552_s28  ;;  %p1558_p0 = scmp.lt.s32.totalorder %s1552_s28, %s1552_s28 }
 0x154   :  { %v623_v30 = vmul.f32 %v607_v16, %v596_v24  ;;  %v624_v31 = vmul.f32 %v608_v20, %v597_v25  ;;  %v649_v52 = vmul.f32 %v633_v13, %v596_v24  ;;  %v650_v43 = vmul.f32 %v634_v17, %v597_v25  ;;  %v1310_v1 = vpop.f32.mrf.mxu0 }
 0x155   :  { %v766_v38 = vsel %vm765_vm8, %v764_v27, %v763_v33  ;;  %v875_v46 = vsel %vm765_vm8, %v874_v32, %v873_v37  ;;  %1386 = vtanh.f32 %v714_v63  ;;  %p1559_p1 = por %p1558_p0, %p1557_p13 }
 0x156   :  { %v726_v34 = vpack.c.bf16 %v623_v30, %v623_v30  ;;  %v727_v35 = vpack.c.bf16 %v624_v31, %v624_v31  ;;  %v839_v36 = vpack.c.bf16 %v649_v52, %v649_v52  ;;  %v840_v40 = vpack.c.bf16 %v650_v43, %v650_v43  ;;  %v716_v2 = vpop.f32.mrf.mxu0 }
 0x157   :  { %v769_v51 = vsel %vm768_vm9, %v767_v39, %v766_v38  ;;  %v877_v53 = vsel %vm768_vm9, %v876_v41, %v875_v46  ;;  %p1560_p2 = pnand %p1559_p1, %p1553_p12 }
 0x158   :  { %v753_v42 = vunpack.c.l.b16 %v726_v34  ;;  %v754_v44 = vunpack.c.l.b16 %v727_v35  ;;  %v866_v45 = vunpack.c.l.b16 %v839_v36  ;;  %v867_v47 = vunpack.c.l.b16 %v840_v40  ;;  %v1311_v3 = vpop.f32.mrf.mxu0 }
 0x15a   :  { %v770_v48 = vrot.slane %v753_v42, 2  ;;  %v773_v49 = vrot.slane %v754_v44, 1  ;;  %v878_v50 = vrot.slane %v866_v45, 3  ;;  %v880_v54 = vrot.slane %v867_v47, 2 }
 0x15c   :  { %v772_v55 = vsel %vm771_vm10, %v770_v48, %v769_v51  ;;  %v879_v56 = vsel %vm771_vm10, %v878_v50, %v877_v53 }
 0x15d   :  { %v775_v57 = vsel %vm774_vm11, %v773_v49, %v772_v55  ;;  %v881_v58 = vsel %vm774_vm11, %v880_v54, %v879_v56 }
 0x15e   :  { %v776_v59 = vpack.c.b16 %v775_v57, %v775_v57  ;;  %v882_v60 = vpack.c.b16 %v881_v58, %v881_v58 }
 0x160   :  { %1317 = vmatmul.mubr.msk.bf16.vlgmr.msra.gmra.mxu1 %vm675_vm4, %v776_v59  ;;  %1325 = vmatmul.mubr.msk.bf16.vlgmr.msra.gmra.mxu0 %vm675_vm4, %v882_v60 }
 0x161   :  { %1340 = vmatprep.mubr.msk.bf16.mxu0 %vm1661_vm1, %v1660_v0  ;;  %1332 = vmatprep.mubr.msk.bf16.mxu1 %vm1661_vm1, %v1660_v0 }
 0x162   :  { %1337 = vmatpush3.bf16.msra.mxu0 %v1380_v4  ;;  %v1387_v5 = vpop.eup %1386  ;;  %1329 = vmatpush3.bf16.msra.mxu1 %v1382_v7 }
 0x163   :  { %1338 = vmatprep.subr.bf16.mxu0 %v1660_v0  ;;  %939 = vst.msk [vmem:[#allocation18] sm:$0xff] %vm675_vm4, %v1387_v5  ;;  %v942_v8 = vpack.c.bf16 %v1387_v5, %v1387_v5  ;;  %1330 = vmatprep.subr.bf16.mxu1 %v1660_v0 }
 0x166   :  { %1339 = vmatpush3.bf16.msra.mxu0 %v1381_v6  ;;  %1331 = vmatpush3.bf16.msra.mxu1 %v1383_v9 }
 0x167   :  { %1344 = vmatprep.subr.bf16.mxu1 %v1660_v0 }
 0x169   :  { %1341 = vmatmul.mubr.msk.bf16.vlgmr.msra.gmra.mxu0 %vm675_vm4, %v942_v8 }
 0x220   :  { %v826_v12 = vpop.f32.mrf.mxu1  ;;  %v932_v13 = vpop.f32.mrf.mxu0 }
 0x221   :  { %v827_v14 = vadd.f32 %v1204_v10, %v826_v12  ;;  %v933_v15 = vadd.f32 %v1208_v11, %v932_v13 }
 0x222   :  { %v1318_v16 = vpop.f32.mrf.mxu1  ;;  %v1326_v17 = vpop.f32.mrf.mxu0 }
 0x223   :  { %1388 = vtanh.f32 %v827_v14 }
 0x224   :  { %1390 = vtanh.f32 %v933_v15  ;;  %v829_v18 = vpop.f32.mrf.mxu1  ;;  %v935_v19 = vpop.f32.mrf.mxu0 }
 0x226   :  { %v1319_v20 = vpop.f32.mrf.mxu1  ;;  %v1327_v21 = vpop.f32.mrf.mxu0 }
 0x229   :  { %v1056_v28 = vpop.f32.mrf.mxu0 }
 0x22b   :  { %v1342_v29 = vpop.f32.mrf.mxu0 }
 0x22d   :  { %v1059_v30 = vpop.f32.mrf.mxu0 }
 0x22f   :  { %v1343_v31 = vpop.f32.mrf.mxu0 }
 0x230   :  { %v1389_v22 = vpop.eup %1388 }
 0x231   :  { %v1391_v24 = vpop.eup %1390  ;;  %940 = vst.msk [vmem:[#allocation20] sm:$0xff] %vm675_vm4, %v1389_v22  ;;  %v947_v25 = vpack.c.bf16 %v1389_v22, %v1389_v22 }
 0x232   :  { %941 = vst.msk [vmem:[#allocation21] sm:$0xff] %vm675_vm4, %v1391_v24  ;;  %v1062_v27 = vpack.c.bf16 %v1391_v24, %v1391_v24 }
 0x233   :  { %1333 = vmatmul.mubr.msk.bf16.vlgmr.msra.gmra.mxu1 %vm675_vm4, %v947_v25 }
 0x234   :  { %1345 = vmatpush3.bf16.msra.mxu1 %v1384_v23  ;;  %1348 = vmatprep.mubr.msk.bf16.mxu1 %vm1661_vm1, %v1660_v0 }
 0x235   :  { %1346 = vmatprep.subr.bf16.mxu1 %v1660_v0 }
 0x238   :  { %1347 = vmatpush3.bf16.msra.mxu1 %v1385_v26 }
 0x23b   :  { %1349 = vmatmul.mubr.msk.bf16.vlgmr.msra.gmra.mxu1 %vm675_vm4, %v1062_v27 }
 0x23c   :  { %1563 = shalt.err (!%p1560_p2)
}
 0x23d   :  { %1151 = dma.vmem_to_hbm [thread:$0]  %s1149_s9, 128, %s1975_s15, [#allocation19]  }
 0x23e   :  { %s1665_s30 = smov [#allocation20]   ;;  %s1666_s6 = smov [#allocation21]  }
 0x23f   :  { %s1158_s2 = sshll.u32 %s1665_s30, 4  ;;  %s1168_s18 = sshll.u32 %s1666_s6, 4  ;;  %s1159_s2 = int_to_ptr.vmem [resolvable:$true] %s1158_s2  ;;  %s1169_s18 = int_to_ptr.vmem [resolvable:$true] %s1168_s18 }
 0x240   :  { %s1572_s19 = scalar_lea.vmem %s1159_s2, 128  ;;  %p1577_p4 = scmp.lt.s32.totalorder %s1159_s2, %s1159_s2 }
 0x241   :  { %p1573_p3 = scmp.ne.s32.totalorder %s1159_s2, %s1572_s19  ;;  %p1578_p5 = scmp.lt.s32.totalorder %s1572_s19, %s1572_s19 }
 0x243   :  { %p1579_p6 = por %p1578_p5, %p1577_p4 }
 0x245   :  { %p1580_p7 = pnand %p1579_p6, %p1573_p3 }
 0x247   :  { %1583 = shalt.err (!%p1580_p7)
}
 0x248   :  { %1161 = dma.vmem_to_hbm [thread:$0]  %s1159_s2, 128, %s1976_s16, [#allocation19]  }
 0x249   :  { %s1592_s8 = scalar_lea.vmem %s1169_s18, 128  ;;  %p1597_p9 = scmp.lt.s32.totalorder %s1169_s18, %s1169_s18 }
 0x24a   :  { %p1593_p8 = scmp.ne.s32.totalorder %s1169_s18, %s1592_s8  ;;  %p1598_p10 = scmp.lt.s32.totalorder %s1592_s8, %s1592_s8 }
 0x24c   :  { %p1599_p11 = por %p1598_p10, %p1597_p9 }
 0x24e   :  { %p1600_p12 = pnand %p1599_p11, %p1593_p8 }
 0x250   :  { %1603 = shalt.err (!%p1600_p12)
}
 0x251   :  { %1171 = dma.vmem_to_hbm [thread:$0]  %s1169_s18, 128, %s1977_s17, [#allocation22]   ;;  %v1221_v35 = vld [vmem:[%s1973_s13] ss:$0 sm:$0xff] }
 0x252   :  { %s1667_s12 = smov [#allocation17]  }
 0x253   :  { %s1138_s3 = sshll.u32 %s1667_s12, 4  ;;  %s1139_s3 = int_to_ptr.vmem [resolvable:$true] %s1138_s3 }
 0x254   :  { %s1612_s17 = scalar_lea.vmem %s1139_s3, 128  ;;  %p1617_p0 = scmp.lt.s32.totalorder %s1139_s3, %s1139_s3 }
 0x255   :  { %p1613_p13 = scmp.ne.s32.totalorder %s1139_s3, %s1612_s17  ;;  %p1618_p1 = scmp.lt.s32.totalorder %s1612_s17, %s1612_s17 }
 0x257   :  { %p1619_p2 = por %p1618_p1, %p1617_p0 }
 0x259   :  { %p1620_p3 = pnand %p1619_p2, %p1613_p13 }
 0x2f3   :  { %v1001_v0 = vpop.f32.mrf.mxu1 }
 0x2f4   :  { %v1057_v43 = vadd.f32 %v1056_v28, %v1001_v0 }
 0x2f5   :  { %v1334_v52 = vpop.f32.mrf.mxu1 }
 0x2f7   :  { %v1004_v32 = vpop.f32.mrf.mxu1 }
 0x2f9   :  { %v1335_v33 = vpop.f32.mrf.mxu1 }
 0x2fb   :  { %v1116_v34 = vpop.f32.mrf.mxu1 }
 0x2fc   :  { %v1122_v36 = vadd.f32 %v1116_v34, %v1057_v43 }
 0x2fd   :  { %v1350_v37 = vpop.f32.mrf.mxu1 }
 0x2fe   :  { %v1130_v38 = vadd.f32 %v1221_v35, %v1122_v36 }
 0x2ff   :  { %v1119_v39 = vpop.f32.mrf.mxu1 }
 0x300   :  { %1131 = vst [vmem:[#allocation17] sm:$0xff] %v1130_v38 }
 0x301   :  { %v1351_v40 = vpop.f32.mrf.mxu1 }
 0x302   :  { %1623 = shalt.err (!%p1620_p3)
}
 0x303   :  { %1141 = dma.vmem_to_hbm [thread:$0]  %s1139_s3, 128, %s1974_s14, [#allocation5]  }
 0x304   :  { %1642 = dma.done.wait [#allocation5], 128  }
 0x305   :  { %1643 = vsyncadd [#allocation5], 4294967168 }
 0x306   :  { %1644 = dma.done.wait [#allocation19], 256  }
 0x307   :  { %1645 = vsyncadd [#allocation19], 4294967040 }
 0x308   :  { %1646 = dma.done.wait [#allocation22], 128  }
 0x309   :  { %1647 = vsyncadd [#allocation22], 4294967168 }
 0x30a   :  { %1184 = vsyncpa [#allocation4], 1 }
 0x30b   :  { %1185 = vsyncpa [#allocation7], 1 }
 0x30c   :  { %1186 = vsyncpa [#allocation10], 1 }
 0x30d   :  { %1187 = vsyncpa [#allocation13], 1 }
 0x30e   :  { %1188 = vsyncpa [#allocation16], 1 }
 0x30f   :  { %1189 = vsyncpa [#allocation5], 1 }
 0x310   :  { %1190 = vsyncpa [#allocation19], 1 }
 0x311   :  { %1191 = vsyncpa [#allocation22], 1 }

</bundles_post_ra>
